<compile_context>
chip_gen: v7x
topology: tpu7x:2x2x1
jax: 0.10.0
libtpu: 0.0.40
codegen_flags: <defaults>
</compile_context>

<pallas_src>
import jax
import jax.numpy as jnp
from jax import lax
from jax.experimental import pallas as pl
from jax.experimental.pallas import tpu as pltpu


def gmf_kernel(u_idx_ref, i_idx_ref,        # SMEM (scalar prefetch): (B_pad,) int32
               u_tab_ref, i_tab_ref,        # HBM (pl.ANY): (n_users, D), (n_items, D) f32
               w_ref, b_ref,                # VMEM: (1, D), (1, 1) f32
               o_ref,                       # VMEM out: (TB, 1) f32
               u_buf, i_buf, sem):          # scratch: (TB, D) x2 VMEM, DMA sems (2,)
    tb, _ = u_buf.shape
    base = pl.program_id(0) * tb

    # ---- Exact row gather: one small HBM->VMEM DMA per (user, item) row. ----
    # Note: out-of-range indices would trip the DMA bounds check (fault) rather
    # than silently reading garbage; in-range indices are the caller's contract
    # (PyTorch's nn.Embedding also errors on OOB indices).
    def issue(r, carry):
        u = u_idx_ref[base + r]
        it = i_idx_ref[base + r]
        pltpu.make_async_copy(u_tab_ref.at[u], u_buf.at[r], sem.at[0]).start()
        pltpu.make_async_copy(i_tab_ref.at[it], i_buf.at[r], sem.at[1]).start()
        return carry

    lax.fori_loop(0, tb, issue, 0)

    # Wait for every row DMA. The wait only consumes (semaphore, dst size), so a
    # dummy src (row 0) is used — same idiom as the paged-attention reference.
    def drain(r, carry):
        pltpu.make_async_copy(u_tab_ref.at[0], u_buf.at[r], sem.at[0]).wait()
        pltpu.make_async_copy(i_tab_ref.at[0], i_buf.at[r], sem.at[1]).wait()
        return carry

    lax.fori_loop(0, tb, drain, 0)

    # ---- GMF core + Linear(D -> 1) + sigmoid, all in vregs. -----------------
    prod = u_buf[...] * i_buf[...]                               # (TB, D)  VPU
    logits = jnp.sum(prod * w_ref[...], axis=1, keepdims=True)   # (TB, 1)  lane reduce (XLU)
    z = logits + b_ref[...]
    o_ref[...] = 1.0 / (1.0 + jnp.exp(-z))                       # sigmoid (EUP exp)


def gmf_forward(user_idx, item_idx, user_emb, item_emb, w, b, *, tb=512):
    """user_idx/item_idx: (B,) int; user_emb: (n_users, D); item_emb: (n_items, D);
    w: (1, D); b: (1, 1). Returns sigmoid ratings of shape (B, 1) float32."""
    B = int(user_idx.shape[0])
    n_users, D = user_emb.shape
    n_items, D2 = item_emb.shape
    assert D == D2

    # Batch tile: multiple of 8 sublanes; clamp so tiny batches don't over-pad.
    tb_eff = min(tb, ((B + 7) // 8) * 8)
    n_tiles = pl.cdiv(B, tb_eff)
    b_pad = n_tiles * tb_eff
    pad = b_pad - B

    # Padded tail rows gather row 0 (always valid) and are sliced off below.
    u_idx = jnp.pad(user_idx.astype(jnp.int32), (0, pad))
    i_idx = jnp.pad(item_idx.astype(jnp.int32), (0, pad))

    u_tab = user_emb.astype(jnp.float32)       # stays in HBM (pl.ANY)
    i_tab = item_emb.astype(jnp.float32)       # stays in HBM (pl.ANY)
    w_row = w.astype(jnp.float32).reshape(1, D)
    b_sc = b.astype(jnp.float32).reshape(1, 1)

    cost = pl.CostEstimate(
        flops=4 * B * D,                       # product + weighted reduction + bias
        transcendentals=B,                     # sigmoid
        bytes_accessed=2 * B * D * 4 + 2 * B * 4 + B * 4 + (D + 1) * 4,
    )

    out = pl.pallas_call(
        gmf_kernel,
        out_shape=jax.ShapeDtypeStruct((b_pad, 1), jnp.float32),
        grid_spec=pltpu.PrefetchScalarGridSpec(
            num_scalar_prefetch=2,                              # index arrays -> SMEM
            grid=(n_tiles,),
            in_specs=[
                pl.BlockSpec(memory_space=pl.ANY),              # user table (HBM)
                pl.BlockSpec(memory_space=pl.ANY),              # item table (HBM)
                pl.BlockSpec((1, D), lambda t, u, i: (0, 0)),   # Linear weight (grid-invariant)
                pl.BlockSpec((1, 1), lambda t, u, i: (0, 0)),   # Linear bias
            ],
            out_specs=pl.BlockSpec((tb_eff, 1), lambda t, u, i: (t, 0)),
            scratch_shapes=[
                pltpu.VMEM((tb_eff, D), jnp.float32),           # gathered user rows
                pltpu.VMEM((tb_eff, D), jnp.float32),           # gathered item rows
                pltpu.SemaphoreType.DMA((2,)),                  # [user, item] DMA sems
            ],
        ),
        compiler_params=pltpu.CompilerParams(
            dimension_semantics=("parallel",),                  # shard batch tiles across TCs
            vmem_limit_bytes=32 * 1024 * 1024,                  # explicit; safe on v5e/v6e/v7x
        ),
        cost_estimate=cost,
    )(u_idx, i_idx, u_tab, i_tab, w_row, b_sc)

    return out[:B]                                              # (B, 1)


if __name__ == "__main__":
    # Small, module-consistent shapes; B is not a tile/sublane multiple on
    # purpose (exercises the padded-tail path).
    n_users, n_items, latent_dim = 64, 96, 32
    B = 300

    key = jax.random.PRNGKey(0)
    k1, k2, k3, k4, k5, k6 = jax.random.split(key, 6)

    # Deterministic parameter init (Embedding ~ N(0,1); Linear ~ U(-1/sqrt(D), 1/sqrt(D))).
    user_emb = jax.random.normal(k1, (n_users, latent_dim), dtype=jnp.float32)
    item_emb = jax.random.normal(k2, (n_items, latent_dim), dtype=jnp.float32)
    bound = 1.0 / float(latent_dim) ** 0.5
    w = jax.random.uniform(k3, (1, latent_dim), minval=-bound, maxval=bound,
                           dtype=jnp.float32)
    b = jax.random.uniform(k4, (1, 1), minval=-bound, maxval=bound,
                           dtype=jnp.float32)

    user_idx = jax.random.randint(k5, (B,), 0, n_users, dtype=jnp.int32)
    item_idx = jax.random.randint(k6, (B,), 0, n_items, dtype=jnp.int32)

    rating = gmf_forward(user_idx, item_idx, user_emb, item_emb, w, b)
    rating = jax.block_until_ready(rating)

    # Pure-JAX reference (exact gather + weighted reduction + sigmoid).
    ref_prod = user_emb[user_idx] * item_emb[item_idx]                      # (B, D)
    ref = jax.nn.sigmoid(jnp.sum(ref_prod * w[0], axis=-1) + b[0, 0])[:, None]

    assert rating.shape == (B, 1) and rating.dtype == jnp.float32
    max_err = float(jnp.max(jnp.abs(rating - ref)))
    assert jnp.allclose(rating, ref, atol=1e-5, rtol=1e-5), max_err
    print("KERNEL_OK")
</pallas_src>

<mosaic_0001>
module attributes {stable_mosaic.version = 11 : i64} {
  func.func @gmf_kernel(%arg0: i32, %arg1: memref<304xi32, #tpu.memory_space<smem>>, %arg2: memref<304xi32, #tpu.memory_space<smem>>, %arg3: memref<64x32xf32, #tpu.memory_space<any>>, %arg4: memref<96x32xf32, #tpu.memory_space<any>>, %arg5: memref<1x32xf32, #tpu.memory_space<vmem>>, %arg6: memref<1x1xf32, #tpu.memory_space<vmem>>, %arg7: memref<304x1xf32, #tpu.memory_space<vmem>>, %arg8: memref<304x32xf32, #tpu.memory_space<vmem>>, %arg9: memref<304x32xf32, #tpu.memory_space<vmem>>, %arg10: memref<2x!tpu.dma_semaphore, #tpu.memory_space<semaphore_mem>>) attributes {dimension_semantics = [#tpu.dimension_semantics<parallel>], iteration_bounds = array<i64: 1>, scalar_prefetch = 2 : i64, scratch_operands = 3 : i64, tpu.core_type = #tpu.core_type<tc>, window_params = [{}, {}, {pipeline_mode = #tpu.pipeline_mode<synchronous>, transform_indices = @transform_2, window_bounds = array<i64: 1, 32>}, {pipeline_mode = #tpu.pipeline_mode<synchronous>, transform_indices = @transform_3, window_bounds = array<i64: 1, 1>}, {transform_indices = @transform_4, window_bounds = array<i64: 304, 1>}]} {
    %c304_i32 = arith.constant 304 : i32
    %0 = arith.muli %arg0, %c304_i32 : i32
    %c0_i32 = arith.constant 0 : i32
    %c304_i32_0 = arith.constant 304 : i32
    %1 = arith.addi %c0_i32, %c304_i32_0 : i32
    %c1_i32 = arith.constant 1 : i32
    scf.for %arg11 = %c0_i32 to %1 step %c1_i32  : i32 {
      %22 = arith.addi %0, %arg11 : i32
      %23 = arith.index_cast %22 : i32 to index
      %24 = memref.load %arg1[%23] : memref<304xi32, #tpu.memory_space<smem>>
      %25 = arith.addi %0, %arg11 : i32
      %26 = arith.index_cast %25 : i32 to index
      %27 = memref.load %arg2[%26] : memref<304xi32, #tpu.memory_space<smem>>
      %c0_i32_18 = arith.constant 0 : i32
      %c0_i32_19 = arith.constant 0 : i32
      %28 = tpu.memref_slice %arg3[%24, %c0_i32_19] : memref<64x32xf32, #tpu.memory_space<any>> -> memref<1x32xf32, #tpu.memory_space<any>>
      %29 = tpu.memref_squeeze %28 : memref<1x32xf32, #tpu.memory_space<any>> -> memref<32xf32, #tpu.memory_space<any>>
      %c0_i32_20 = arith.constant 0 : i32
      %30 = tpu.memref_slice %arg8[%arg11, %c0_i32_20] : memref<304x32xf32, #tpu.memory_space<vmem>> -> memref<1x32xf32, #tpu.memory_space<vmem>>
      %31 = tpu.memref_squeeze %30 : memref<1x32xf32, #tpu.memory_space<vmem>> -> memref<32xf32, #tpu.memory_space<vmem>>
      %32 = tpu.memref_slice %arg10[%c0_i32_18] : memref<2x!tpu.dma_semaphore, #tpu.memory_space<semaphore_mem>> -> memref<1x!tpu.dma_semaphore, #tpu.memory_space<semaphore_mem>>
      %33 = tpu.memref_squeeze %32 : memref<1x!tpu.dma_semaphore, #tpu.memory_space<semaphore_mem>> -> memref<!tpu.dma_semaphore, #tpu.memory_space<semaphore_mem>>
      tpu.enqueue_dma source(%29 : memref<32xf32, #tpu.memory_space<any>>) target(%31 : memref<32xf32, #tpu.memory_space<vmem>>) target_semaphore(%33 : memref<!tpu.dma_semaphore, #tpu.memory_space<semaphore_mem>>)
      %c1_i32_21 = arith.constant 1 : i32
      %c0_i32_22 = arith.constant 0 : i32
      %34 = tpu.memref_slice %arg4[%27, %c0_i32_22] : memref<96x32xf32, #tpu.memory_space<any>> -> memref<1x32xf32, #tpu.memory_space<any>>
      %35 = tpu.memref_squeeze %34 : memref<1x32xf32, #tpu.memory_space<any>> -> memref<32xf32, #tpu.memory_space<any>>
      %c0_i32_23 = arith.constant 0 : i32
      %36 = tpu.memref_slice %arg9[%arg11, %c0_i32_23] : memref<304x32xf32, #tpu.memory_space<vmem>> -> memref<1x32xf32, #tpu.memory_space<vmem>>
      %37 = tpu.memref_squeeze %36 : memref<1x32xf32, #tpu.memory_space<vmem>> -> memref<32xf32, #tpu.memory_space<vmem>>
      %38 = tpu.memref_slice %arg10[%c1_i32_21] : memref<2x!tpu.dma_semaphore, #tpu.memory_space<semaphore_mem>> -> memref<1x!tpu.dma_semaphore, #tpu.memory_space<semaphore_mem>>
      %39 = tpu.memref_squeeze %38 : memref<1x!tpu.dma_semaphore, #tpu.memory_space<semaphore_mem>> -> memref<!tpu.dma_semaphore, #tpu.memory_space<semaphore_mem>>
      tpu.enqueue_dma source(%35 : memref<32xf32, #tpu.memory_space<any>>) target(%37 : memref<32xf32, #tpu.memory_space<vmem>>) target_semaphore(%39 : memref<!tpu.dma_semaphore, #tpu.memory_space<semaphore_mem>>)
    }
    %c304_i32_1 = arith.constant 304 : i32
    %c0_i32_2 = arith.constant 0 : i32
    %c304_i32_3 = arith.constant 304 : i32
    %2 = arith.addi %c0_i32_2, %c304_i32_3 : i32
    %c1_i32_4 = arith.constant 1 : i32
    scf.for %arg11 = %c0_i32_2 to %2 step %c1_i32_4  : i32 {
      %c0_i32_18 = arith.constant 0 : i32
      %c0_i32_19 = arith.constant 0 : i32
      %c0_i32_20 = arith.constant 0 : i32
      %22 = tpu.memref_slice %arg3[%c0_i32_18, %c0_i32_20] : memref<64x32xf32, #tpu.memory_space<any>> -> memref<1x32xf32, #tpu.memory_space<any>>
      %23 = tpu.memref_squeeze %22 : memref<1x32xf32, #tpu.memory_space<any>> -> memref<32xf32, #tpu.memory_space<any>>
      %c0_i32_21 = arith.constant 0 : i32
      %24 = tpu.memref_slice %arg8[%arg11, %c0_i32_21] : memref<304x32xf32, #tpu.memory_space<vmem>> -> memref<1x32xf32, #tpu.memory_space<vmem>>
      %25 = tpu.memref_squeeze %24 : memref<1x32xf32, #tpu.memory_space<vmem>> -> memref<32xf32, #tpu.memory_space<vmem>>
      %26 = tpu.memref_slice %arg10[%c0_i32_19] : memref<2x!tpu.dma_semaphore, #tpu.memory_space<semaphore_mem>> -> memref<1x!tpu.dma_semaphore, #tpu.memory_space<semaphore_mem>>
      %27 = tpu.memref_squeeze %26 : memref<1x!tpu.dma_semaphore, #tpu.memory_space<semaphore_mem>> -> memref<!tpu.dma_semaphore, #tpu.memory_space<semaphore_mem>>
      tpu.wait_dma2 semaphore(%27 : memref<!tpu.dma_semaphore, #tpu.memory_space<semaphore_mem>>) src(%23 : memref<32xf32, #tpu.memory_space<any>>) dst(%25 : memref<32xf32, #tpu.memory_space<vmem>>)
      %c0_i32_22 = arith.constant 0 : i32
      %c1_i32_23 = arith.constant 1 : i32
      %c0_i32_24 = arith.constant 0 : i32
      %28 = tpu.memref_slice %arg4[%c0_i32_22, %c0_i32_24] : memref<96x32xf32, #tpu.memory_space<any>> -> memref<1x32xf32, #tpu.memory_space<any>>
      %29 = tpu.memref_squeeze %28 : memref<1x32xf32, #tpu.memory_space<any>> -> memref<32xf32, #tpu.memory_space<any>>
      %c0_i32_25 = arith.constant 0 : i32
      %30 = tpu.memref_slice %arg9[%arg11, %c0_i32_25] : memref<304x32xf32, #tpu.memory_space<vmem>> -> memref<1x32xf32, #tpu.memory_space<vmem>>
      %31 = tpu.memref_squeeze %30 : memref<1x32xf32, #tpu.memory_space<vmem>> -> memref<32xf32, #tpu.memory_space<vmem>>
      %32 = tpu.memref_slice %arg10[%c1_i32_23] : memref<2x!tpu.dma_semaphore, #tpu.memory_space<semaphore_mem>> -> memref<1x!tpu.dma_semaphore, #tpu.memory_space<semaphore_mem>>
      %33 = tpu.memref_squeeze %32 : memref<1x!tpu.dma_semaphore, #tpu.memory_space<semaphore_mem>> -> memref<!tpu.dma_semaphore, #tpu.memory_space<semaphore_mem>>
      tpu.wait_dma2 semaphore(%33 : memref<!tpu.dma_semaphore, #tpu.memory_space<semaphore_mem>>) src(%29 : memref<32xf32, #tpu.memory_space<any>>) dst(%31 : memref<32xf32, #tpu.memory_space<vmem>>)
    }
    %c304_i32_5 = arith.constant 304 : i32
    %c0 = arith.constant 0 : index
    %c0_6 = arith.constant 0 : index
    %3 = vector.load %arg8[%c0, %c0_6] : memref<304x32xf32, #tpu.memory_space<vmem>>, vector<304x32xf32>
    %c0_7 = arith.constant 0 : index
    %c0_8 = arith.constant 0 : index
    %4 = vector.load %arg9[%c0_7, %c0_8] : memref<304x32xf32, #tpu.memory_space<vmem>>, vector<304x32xf32>
    %5 = arith.mulf %3, %4 : vector<304x32xf32>
    %c0_9 = arith.constant 0 : index
    %c0_10 = arith.constant 0 : index
    %6 = vector.load %arg5[%c0_9, %c0_10] : memref<1x32xf32, #tpu.memory_space<vmem>>, vector<1x32xf32>
    %7 = vector.broadcast %6 : vector<1x32xf32> to vector<304x32xf32>
    %8 = arith.mulf %5, %7 : vector<304x32xf32>
    %cst = arith.constant dense<0.000000e+00> : vector<304xf32>
    %9 = vector.multi_reduction <add>, %8, %cst [1] : vector<304x32xf32> to vector<304xf32>
    %10 = vector.shape_cast %9 : vector<304xf32> to vector<304x1xf32>
    %c0_11 = arith.constant 0 : index
    %c0_12 = arith.constant 0 : index
    %11 = vector.load %arg6[%c0_11, %c0_12] : memref<1x1xf32, #tpu.memory_space<vmem>>, vector<1x1xf32>
    %12 = vector.broadcast %11 : vector<1x1xf32> to vector<304x1xf32>
    %13 = arith.addf %10, %12 : vector<304x1xf32>
    %cst_13 = arith.constant 0.000000e+00 : f32
    %14 = vector.broadcast %cst_13 : f32 to vector<304x1xf32>
    %15 = arith.subf %14, %13 : vector<304x1xf32>
    %16 = math.exp %15 : vector<304x1xf32>
    %cst_14 = arith.constant 1.000000e+00 : f32
    %17 = vector.broadcast %cst_14 : f32 to vector<304x1xf32>
    %18 = arith.addf %17, %16 : vector<304x1xf32>
    %cst_15 = arith.constant 1.000000e+00 : f32
    %19 = vector.broadcast %cst_15 : f32 to vector<304x1xf32>
    %20 = arith.divf %19, %18 : vector<304x1xf32>
    %c0_16 = arith.constant 0 : index
    %c0_17 = arith.constant 0 : index
    %21 = vector.load %arg7[%c0_16, %c0_17] : memref<304x1xf32, #tpu.memory_space<vmem>>, vector<304x1xf32>
    tpu.vector_store %arg7[%c0_16, %c0_17], %20 {strides = array<i32>} : memref<304x1xf32, #tpu.memory_space<vmem>>, vector<304x1xf32>,
    return
  }
  func.func @transform_2(%arg0: i32, %arg1: memref<304xi32, #tpu.memory_space<smem>>, %arg2: memref<304xi32, #tpu.memory_space<smem>>) -> (i32, i32) {
    %c0_i32 = arith.constant 0 : i32
    %c0_i32_0 = arith.constant 0 : i32
    %c0_i32_1 = arith.constant 0 : i32
    return %c0_i32, %c0_i32_0 : i32, i32
  }
  func.func @transform_3(%arg0: i32, %arg1: memref<304xi32, #tpu.memory_space<smem>>, %arg2: memref<304xi32, #tpu.memory_space<smem>>) -> (i32, i32) {
    %c0_i32 = arith.constant 0 : i32
    %c0_i32_0 = arith.constant 0 : i32
    %c0_i32_1 = arith.constant 0 : i32
    return %c0_i32, %c0_i32_0 : i32, i32
  }
  func.func @transform_4(%arg0: i32, %arg1: memref<304xi32, #tpu.memory_space<smem>>, %arg2: memref<304xi32, #tpu.memory_space<smem>>) -> (i32, i32) {
    %c0_i32 = arith.constant 0 : i32
    %c0_i32_0 = arith.constant 0 : i32
    return %arg0, %c0_i32 : i32, i32
  }
}

</mosaic_0001>

<bundles_post_ra>
// kernel: tpu_custom_call.1
= control target key start
LH: loop header
LB: loop body
LE: loop exit
PB: predicated region body
PF: predicated region fallthrough
CT: control target
= control target key end

     0   :  { %s1341_s0 = inlined_call_operand.vmem [shape: s32[304], index: 0, kind: input, shape index: {}]   ;;  %s1342_s2 = inlined_call_operand.vmem [shape: f32[64,32], index: 2, kind: input, shape index: {}]   ;;  %s1343_s3 = inlined_call_operand.vmem [shape: f32[96,32], index: 3, kind: input, shape index: {}]   ;;  %s1344_s4 = inlined_call_operand.vmem [shape: f32[1,32], index: 4, kind: input, shape index: {}]   ;;  %s1345_s6 = inlined_call_operand.vmem [shape: f32[304,1], index: 6, kind: output, shape index: {}]   ;;  %s1346_s1 = inlined_call_operand.vmem [shape: s32[304], index: 1, kind: input, shape index: {}]   ;;  %s1347_s5 = inlined_call_operand.<no memory space> [shape: f32[1,1], index: 5, kind: input, shape index: {}]  }
   0x1   :  { %s11_s23 = sshll.u32 %s1341_s0, 4  ;;  %s15_s26 = sshll.u32 %s1346_s1, 4  ;;  %v19_v0 = vstv %s1347_s5  ;;  %s12_s23 = int_to_ptr.vmem [resolvable:$true] %s11_s23  ;;  %s16_s26 = int_to_ptr.vmem [resolvable:$true] %s15_s26 }
   0x2   :  { %20 = vst [vmem:[#allocation8] sm:$0x1] %v19_v0  ;;  %s952_s29 = scalar_lea.vmem %s12_s23, 48  ;;  %s956_s30 = scalar_lea.vmem %s12_s23, 64 }
   0x3   :  { %p953_p0 = scmp.ne.s32.totalorder %s12_s23, %s952_s29  ;;  %p957_p1 = scmp.lt.s32.totalorder %s12_s23, %s12_s23 }
   0x4   :  { %p958_p2 = scmp.lt.s32.totalorder %s956_s30, %s952_s29 }
   0x6   :  { %p959_p3 = por %p958_p2, %p957_p1 }
   0x8   :  { %p960_p4 = pnand %p959_p3, %p953_p0 }
   0xa   :  { %963 = shalt.err (!%p960_p4)  }
   0xb   :  { %s998_s0 = smov [#allocation6]   ;;  %s964_s7 = scalar_lea.vmem %s16_s26, 48 }
   0xc   :  { %14 = dma.vmem_to_smem %s12_s23, 48, %s998_s0, [#allocation5] }
   0xd   :  { %p965_p5 = scmp.ne.s32.totalorder %s16_s26, %s964_s7  ;;  %s968_s1 = scalar_lea.vmem %s16_s26, 64 }
   0xe   :  { %p969_p6 = scmp.lt.s32.totalorder %s16_s26, %s16_s26  ;;  %p970_p7 = scmp.lt.s32.totalorder %s968_s1, %s964_s7 }
  0x10   :  { %p971_p8 = por %p970_p7, %p969_p6 }
  0x12   :  { %p972_p9 = pnand %p971_p8, %p965_p5 }
  0x14   :  { %975 = shalt.err (!%p972_p9)  }
  0x15   :  { %s999_s5 = smov [#allocation7]  }
  0x16   :  { %18 = dma.vmem_to_smem %s16_s26, 48, %s999_s5, [#allocation5] }
  0x17   :  { %984 = dma.done.wait [#allocation5], 96 }
  0x18   :  { %985 = vsyncadd [#allocation5], 4294967200 }
  0x19   :  { %22 = sfence }
  0x1a   :  { %s990_s8 = smov 0  }
  0x1b LB: > { %s35_s9 = sld [smem:[#allocation6 + %s992_s8]]  ;;  %s38_s14 = scalar_lea.vmem [#allocation2], %s992_s8  ;;  %s992_s8 = sphi %s990_s8, %s33_s8  }
  0x1c   : > { %s36_s10 = sld [smem:[#allocation7 + %s992_s8]] }
  0x21   : > { %s37_s13 = scalar_lea.vmem %s1342_s2, %s35_s9 }
  0x22   : > { %v56_v1 = vld [vmem:[%s37_s13] sm:$0x1] }
  0x23   : > { %57 = vst [vmem:[%s38_s14] sm:$0x1] %v56_v1 }
  0x24   : > { %82 = vsyncadd [#allocation4], 16  ;;  %s83_s17 = scalar_lea.vmem %s1343_s3, %s36_s10  ;;  %s84_s18 = scalar_lea.vmem [#allocation3], %s992_s8 }
  0x25   : > { %v103_v2 = vld [vmem:[%s83_s17] sm:$0x1] }
  0x26   : > { %104 = vst [vmem:[%s84_s18] sm:$0x1] %v103_v2 }
  0x27   : > { %129 = vsyncadd [#allocation4 + $0x1], 16  ;;  %s33_s8 = sadd.s32 1, %s992_s8  }
  0x28   : > { %p30_p10 = scmp.ge.s32.totalorder %s33_s8, 304  }
  0x29   :  { %s994_s19 = smov (%p30_p10), 0  }
  0x2a   :  { %32 = sbr.rel (!%p30_p10) target bundleno = 27 (0x1b), region = 129 }
  0x31 LB: > { %986 = dma.done.wait [#allocation4], 16  ;;  %s996_s19 = sphi %s994_s19, %s135_s19  }
  0x32   : > { %987 = vsyncadd [#allocation4], 4294967280 }
  0x33   : > { %988 = dma.done.wait [#allocation4 + $0x1], 16 }
  0x34   : > { %989 = vsyncadd [#allocation4 + $0x1], 4294967280  ;;  %s135_s19 = sadd.s32 1, %s996_s19  }
  0x35   : > { %p132_p11 = scmp.ge.s32.totalorder %s135_s19, 304  }
  0x36   :  { %v143_v3 = vld [vmem:[#allocation2 + $0x10] sm:$0xff] (%p132_p11)  ;;  %v181_v4 = vld [vmem:[#allocation3 + $0x10] sm:$0xff] (%p132_p11)  ;;  %v144_v9 = vld [vmem:[#allocation2 + $0x18] sm:$0xff] (%p132_p11)  ;;  %vm300_vm0 = vcmask (%p132_p11), 261120   ;;  %vm688_vm1 = vcmask (%p132_p11), 7168  }
  0x37   :  { %134 = sbr.rel (!%p132_p11) target bundleno = 49 (0x31), region = 140  ;;  %v1053_v5 = vld [vmem:[%s1344_s4] ss:$0 sm:$0xff] (%p132_p11)  ;;  %v219_v6 = vmul.f32 (%p132_p11), %v181_v4, %v143_v3  ;;  %v179_v8 = vld [vmem:[#allocation3] sm:$0xff] (%p132_p11)  ;;  %v182_v11 = vld [vmem:[#allocation3 + $0x18] sm:$0xff] (%p132_p11) }
  0x38   :  { %v141_v7 = vld [vmem:[#allocation2] sm:$0xff] (%p132_p11)  ;;  %v142_v12 = vld [vmem:[#allocation2 + $0x8] sm:$0xff] (%p132_p11)  ;;  %v180_v13 = vld [vmem:[#allocation3 + $0x8] sm:$0xff] (%p132_p11)  ;;  %v220_v15 = vmul.f32 (%p132_p11), %v182_v11, %v144_v9 }
  0x39   :  { %v217_v10 = vmul.f32 (%p132_p11), %v179_v8, %v141_v7  ;;  %v264_v14 = vmul.f32 (%p132_p11), %v1053_v5, %v219_v6  ;;  %v218_v16 = vmul.f32 (%p132_p11), %v180_v13, %v142_v12  ;;  %v146_v17 = vld [vmem:[#allocation2 + $0x28] sm:$0xff] (%p132_p11)  ;;  %v184_v18 = vld [vmem:[#allocation3 + $0x28] sm:$0xff] (%p132_p11)  ;;  %v145_v19 = vld [vmem:[#allocation2 + $0x20] sm:$0xff] (%p132_p11) }
  0x3a   :  { %v222_v21 = vmul.f32 (%p132_p11), %v184_v18, %v146_v17  ;;  %v183_v22 = vld [vmem:[#allocation3 + $0x20] sm:$0xff] (%p132_p11)  ;;  %v148_v23 = vld [vmem:[#allocation2 + $0x38] sm:$0xff] (%p132_p11)  ;;  %v186_v24 = vld [vmem:[#allocation3 + $0x38] sm:$0xff] (%p132_p11)  ;;  %v265_v26 = vmul.f32 (%p132_p11), %v1053_v5, %v220_v15 }
  0x3b   :  { %v262_v20 = vmul.f32 (%p132_p11), %v1053_v5, %v217_v10  ;;  %v307_v25 = vsel (%p132_p11), %vm300_vm0, %v264_v14, 0.0  ;;  %v263_v27 = vmul.f32 (%p132_p11), %v1053_v5, %v218_v16  ;;  %v221_v28 = vmul.f32 (%p132_p11), %v183_v22, %v145_v19  ;;  %v147_v29 = vld [vmem:[#allocation2 + $0x30] sm:$0xff] (%p132_p11)  ;;  %v185_v30 = vld [vmem:[#allocation3 + $0x30] sm:$0xff] (%p132_p11)  ;;  %v150_v38 = vld [vmem:[#allocation2 + $0x48] sm:$0xff] (%p132_p11) }
  0x3c   :  { %308 = vadd.xlane.f32.xlu1 (%p132_p11), %v307_v25  ;;  %v310_v32 = vsel (%p132_p11), %vm300_vm0, %v265_v26, 0.0  ;;  %v267_v33 = vmul.f32 (%p132_p11), %v1053_v5, %v222_v21  ;;  %v224_v34 = vmul.f32 (%p132_p11), %v186_v24, %v148_v23  ;;  %v223_v37 = vmul.f32 (%p132_p11), %v185_v30, %v147_v29  ;;  %v188_v39 = vld [vmem:[#allocation3 + $0x48] sm:$0xff] (%p132_p11)  ;;  %v149_v40 = vld [vmem:[#allocation2 + $0x40] sm:$0xff] (%p132_p11)  ;;  %v187_v41 = vld [vmem:[#allocation3 + $0x40] sm:$0xff] (%p132_p11) }
  0x3d   :  { %v301_v31 = vsel (%p132_p11), %vm300_vm0, %v262_v20, 0.0  ;;  %v304_v35 = vsel (%p132_p11), %vm300_vm0, %v263_v27, 0.0  ;;  %v266_v36 = vmul.f32 (%p132_p11), %v1053_v5, %v221_v28  ;;  %v226_v44 = vmul.f32 (%p132_p11), %v188_v39, %v150_v38  ;;  %v152_v48 = vld [vmem:[#allocation2 + $0x58] sm:$0xff] (%p132_p11)  ;;  %v190_v49 = vld [vmem:[#allocation3 + $0x58] sm:$0xff] (%p132_p11)  ;;  %v151_v50 = vld [vmem:[#allocation2 + $0x50] sm:$0xff] (%p132_p11) }
  0x3e   :  { %302 = vadd.xlane.f32.xlu0 %v301_v31  ;;  %v316_v42 = vsel %vm300_vm0, %v267_v33, 0.0  ;;  %v269_v43 = vmul.f32 %v1053_v5, %v224_v34  ;;  %v268_v46 = vmul.f32 %v1053_v5, %v223_v37  ;;  %v225_v47 = vmul.f32 %v187_v41, %v149_v40  ;;  %v189_v51 = vld [vmem:[#allocation3 + $0x50] sm:$0xff]  ;;  %v154_v55 = vld [vmem:[#allocation2 + $0x68] sm:$0xff]  ;;  %v192_v56 = vld [vmem:[#allocation3 + $0x68] sm:$0xff] }
  0x3f   :  { %v313_v45 = vsel %vm300_vm0, %v266_v36, 0.0  ;;  %v271_v53 = vmul.f32 %v1053_v5, %v226_v44  ;;  %v228_v54 = vmul.f32 %v190_v49, %v152_v48  ;;  %v227_v59 = vmul.f32 %v189_v51, %v151_v50  ;;  %v153_v60 = vld [vmem:[#allocation2 + $0x60] sm:$0xff]  ;;  %v191_v61 = vld [vmem:[#allocation3 + $0x60] sm:$0xff]  ;;  %v156_v1 = vld [vmem:[#allocation2 + $0x78] sm:$0xff] }
  0x40   :  { %311 = vadd.xlane.f32.xlu1 %v310_v32  ;;  %v322_v52 = vsel %vm300_vm0, %v269_v43, 0.0  ;;  %v319_v57 = vsel %vm300_vm0, %v268_v46, 0.0  ;;  %v270_v58 = vmul.f32 %v1053_v5, %v225_v47  ;;  %v230_v62 = vmul.f32 %v192_v56, %v154_v55  ;;  %v194_v2 = vld [vmem:[#allocation3 + $0x78] sm:$0xff]  ;;  %v155_v7 = vld [vmem:[#allocation2 + $0x70] sm:$0xff]  ;;  %v193_v8 = vld [vmem:[#allocation3 + $0x70] sm:$0xff] }
  0x41   :  { %v328_v63 = vsel %vm300_vm0, %v271_v53, 0.0  ;;  %v273_v0 = vmul.f32 %v1053_v5, %v228_v54  ;;  %v272_v4 = vmul.f32 %v1053_v5, %v227_v59  ;;  %v229_v6 = vmul.f32 %v191_v61, %v153_v60  ;;  %v158_v9 = vld [vmem:[#allocation2 + $0x88] sm:$0xff]  ;;  %v196_v12 = vld [vmem:[#allocation3 + $0x88] sm:$0xff]  ;;  %v157_v17 = vld [vmem:[#allocation2 + $0x80] sm:$0xff] }
  0x42   :  { %305 = vadd.xlane.f32.xlu0 %v304_v35  ;;  %v325_v3 = vsel %vm300_vm0, %v270_v58, 0.0  ;;  %v275_v10 = vmul.f32 %v1053_v5, %v230_v62  ;;  %v232_v11 = vmul.f32 %v194_v2, %v156_v1  ;;  %v174_v13 = vld [vmem:[#allocation2 + $0x108] sm:$0xff]  ;;  %v212_v14 = vld [vmem:[#allocation3 + $0x108] sm:$0xff]  ;;  %v231_v16 = vmul.f32 %v193_v8, %v155_v7  ;;  %v173_v18 = vld [vmem:[#allocation2 + $0x100] sm:$0xff] }
  0x43   :  { %v334_v15 = vsel %vm300_vm0, %v273_v0, 0.0  ;;  %v211_v19 = vld [vmem:[#allocation3 + $0x100] sm:$0xff]  ;;  %v176_v20 = vld [vmem:[#allocation2 + $0x118] sm:$0xff]  ;;  %v331_v21 = vsel %vm300_vm0, %v272_v4, 0.0  ;;  %v274_v22 = vmul.f32 %v1053_v5, %v229_v6  ;;  %v214_v23 = vld [vmem:[#allocation3 + $0x118] sm:$0xff]  ;;  %v250_v27 = vmul.f32 %v212_v14, %v174_v13 }
  0x44   :  { %317 = vadd.xlane.f32.xlu1 %v316_v42  ;;  %v175_v24 = vld [vmem:[#allocation2 + $0x110] sm:$0xff]  ;;  %v213_v25 = vld [vmem:[#allocation3 + $0x110] sm:$0xff]  ;;  %v178_v28 = vld [vmem:[#allocation2 + $0x128] sm:$0xff]  ;;  %v340_v30 = vsel %vm300_vm0, %v275_v10, 0.0  ;;  %v277_v31 = vmul.f32 %v1053_v5, %v232_v11  ;;  %v234_v32 = vmul.f32 %v196_v12, %v158_v9  ;;  %v249_v33 = vmul.f32 %v211_v19, %v173_v18 }
  0x45   :  { %v195_v26 = vld [vmem:[#allocation3 + $0x80] sm:$0xff]  ;;  %v216_v29 = vld [vmem:[#allocation3 + $0x128] sm:$0xff]  ;;  %v177_v34 = vld [vmem:[#allocation2 + $0x120] sm:$0xff]  ;;  %v276_v36 = vmul.f32 %v1053_v5, %v231_v16  ;;  %v295_v39 = vmul.f32 %v1053_v5, %v250_v27  ;;  %v252_v40 = vmul.f32 %v214_v23, %v176_v20  ;;  %v251_v41 = vmul.f32 %v213_v25, %v175_v24 }
  0x46   :  { %314 = vadd.xlane.f32.xlu0 %v313_v45  ;;  %v215_v35 = vld [vmem:[#allocation3 + $0x120] sm:$0xff]  ;;  %v160_v37 = vld [vmem:[#allocation2 + $0x98] sm:$0xff]  ;;  %v198_v38 = vld [vmem:[#allocation3 + $0x98] sm:$0xff]  ;;  %v337_v42 = vsel %vm300_vm0, %v274_v22, 0.0  ;;  %v233_v43 = vmul.f32 %v195_v26, %v157_v17  ;;  %v294_v44 = vmul.f32 %v1053_v5, %v249_v33  ;;  %v254_v45 = vmul.f32 %v216_v29, %v178_v28 }
  0x47   :  { %v159_v46 = vld [vmem:[#allocation2 + $0x90] sm:$0xff]  ;;  %v197_v47 = vld [vmem:[#allocation3 + $0x90] sm:$0xff]  ;;  %v1088_v48 = vsel %vm300_vm0, %v295_v39, 0.0  ;;  %v297_v49 = vmul.f32 %v1053_v5, %v252_v40  ;;  %v296_v50 = vmul.f32 %v1053_v5, %v251_v41  ;;  %v253_v51 = vmul.f32 %v215_v35, %v177_v34  ;;  %v200_v0 = vld [vmem:[#allocation3 + $0xa8] sm:$0xff] }
  0x48   :  { %323 = vadd.xlane.f32.xlu1 %v322_v52  ;;  %v279_v52 = vmul.f32 %v1053_v5, %v234_v32  ;;  %v236_v53 = vmul.f32 %v198_v38, %v160_v37  ;;  %v1094_v54 = vsel %vm300_vm0, %v294_v44, 0.0  ;;  %v299_v55 = vmul.f32 %v1053_v5, %v254_v45  ;;  %v161_v2 = vld [vmem:[#allocation2 + $0xa0] sm:$0xff]  ;;  %v164_v12 = vld [vmem:[#allocation2 + $0xb8] sm:$0xff]  ;;  %v202_v13 = vld [vmem:[#allocation3 + $0xb8] sm:$0xff] }
  0x49   :  { %v346_v56 = vsel %vm300_vm0, %v277_v31, 0.0  ;;  %v1102_v58 = vsel %vm300_vm0, %v296_v50, 0.0  ;;  %v298_v59 = vmul.f32 %v1053_v5, %v253_v51  ;;  %v343_v60 = vsel %vm300_vm0, %v276_v36, 0.0  ;;  %v163_v14 = vld [vmem:[#allocation2 + $0xb0] sm:$0xff]  ;;  %v166_v22 = vld [vmem:[#allocation2 + $0xc8] sm:$0xff]  ;;  %v204_v23 = vld [vmem:[#allocation3 + $0xc8] sm:$0xff] }
  0x4a   :  { %320 = vadd.xlane.f32.xlu0 %v319_v57  ;;  %v1099_v57 = vsel %vm300_vm0, %v297_v49, 0.0  ;;  %v278_v61 = vmul.f32 %v1053_v5, %v233_v43  ;;  %v235_v62 = vmul.f32 %v197_v47, %v159_v46  ;;  %v1108_v1 = vsel %vm300_vm0, %v299_v55, 0.0  ;;  %v165_v24 = vld [vmem:[#allocation2 + $0xc0] sm:$0xff]  ;;  %v203_v25 = vld [vmem:[#allocation3 + $0xc0] sm:$0xff]  ;;  %v168_v32 = vld [vmem:[#allocation2 + $0xd8] sm:$0xff] }
  0x4b   :  { %v1111_v4 = vsel %vm300_vm0, %v298_v59, 0.0  ;;  %v352_v6 = vsel %vm300_vm0, %v279_v52, 0.0  ;;  %v281_v7 = vmul.f32 %v1053_v5, %v236_v53  ;;  %v240_v18 = vmul.f32 %v202_v13, %v164_v12  ;;  %v206_v33 = vld [vmem:[#allocation3 + $0xd8] sm:$0xff]  ;;  %v167_v34 = vld [vmem:[#allocation2 + $0xd0] sm:$0xff]  ;;  %v205_v35 = vld [vmem:[#allocation3 + $0xd0] sm:$0xff] }
  0x4c   :  { %329 = vadd.xlane.f32.xlu1 %v328_v63  ;;  %v162_v63 = vld [vmem:[#allocation2 + $0xa8] sm:$0xff]  ;;  %v349_v9 = vsel %vm300_vm0, %v278_v61, 0.0  ;;  %v280_v10 = vmul.f32 %v1053_v5, %v235_v62  ;;  %v242_v28 = vmul.f32 %v204_v23, %v166_v22  ;;  %v241_v31 = vmul.f32 %v203_v25, %v165_v24  ;;  %v208_v43 = vld [vmem:[#allocation3 + $0xe8] sm:$0xff]  ;;  %v169_v44 = vld [vmem:[#allocation2 + $0xe0] sm:$0xff] }
  0x4d   :  { %v238_v8 = vmul.f32 %v200_v0, %v162_v63  ;;  %v358_v16 = vsel %vm300_vm0, %v281_v7, 0.0  ;;  %v285_v27 = vmul.f32 %v1053_v5, %v240_v18  ;;  %v244_v38 = vmul.f32 %v206_v33, %v168_v32  ;;  %v207_v45 = vld [vmem:[#allocation3 + $0xe0] sm:$0xff]  ;;  %v172_v53 = vld [vmem:[#allocation2 + $0xf8] sm:$0xff]  ;;  %v210_v55 = vld [vmem:[#allocation3 + $0xf8] sm:$0xff] }
  0x4e   :  { %326 = vadd.xlane.f32.xlu0 %v325_v3  ;;  %v199_v3 = vld [vmem:[#allocation3 + $0xa0] sm:$0xff]  ;;  %v355_v19 = vsel %vm300_vm0, %v280_v10, 0.0  ;;  %v287_v37 = vmul.f32 %v1053_v5, %v242_v28  ;;  %v286_v40 = vmul.f32 %v1053_v5, %v241_v31  ;;  %v243_v41 = vmul.f32 %v205_v35, %v167_v34  ;;  %v209_v59 = vld [vmem:[#allocation3 + $0xf0] sm:$0xff] }
  0x4f   :  { %v237_v11 = vmul.f32 %v199_v3, %v161_v2  ;;  %v283_v17 = vmul.f32 %v1053_v5, %v238_v8  ;;  %v370_v36 = vsel %vm300_vm0, %v285_v27, 0.0  ;;  %v289_v47 = vmul.f32 %v1053_v5, %v244_v38 }
  0x50   :  { %335 = vadd.xlane.f32.xlu1 %v334_v15  ;;  %v201_v15 = vld [vmem:[#allocation3 + $0xb0] sm:$0xff]  ;;  %v376_v46 = vsel %vm300_vm0, %v287_v37, 0.0  ;;  %v373_v50 = vsel %vm300_vm0, %v286_v40, 0.0  ;;  %v288_v51 = vmul.f32 %v1053_v5, %v243_v41  ;;  %v245_v52 = vmul.f32 %v207_v45, %v169_v44 }
  0x51   :  { %v282_v20 = vmul.f32 %v1053_v5, %v237_v11  ;;  %v364_v26 = vsel %vm300_vm0, %v283_v17, 0.0  ;;  %v248_v62 = vmul.f32 %v210_v55, %v172_v53 }
  0x52   :  { %332 = vadd.xlane.f32.xlu0 %v331_v21  ;;  %v239_v21 = vmul.f32 %v201_v15, %v163_v14  ;;  %v379_v63 = vsel %vm300_vm0, %v288_v51, 0.0  ;;  %v290_v0 = vmul.f32 %v1053_v5, %v245_v52 }
  0x53   :  { %v361_v29 = vsel %vm300_vm0, %v282_v20, 0.0 }
  0x54   :  { %341 = vadd.xlane.f32.xlu1 %v340_v30  ;;  %v284_v30 = vmul.f32 %v1053_v5, %v239_v21  ;;  %v385_v7 = vsel %vm300_vm0, %v290_v0, 0.0 }
  0x56   :  { %338 = vadd.xlane.f32.xlu0 %v337_v42  ;;  %v367_v39 = vsel %vm300_vm0, %v284_v30, 0.0  ;;  %v170_v42 = vld [vmem:[#allocation2 + $0xe8] sm:$0xff] }
  0x57   :  { %v246_v49 = vmul.f32 %v208_v43, %v170_v42 }
  0x58   :  { %347 = vadd.xlane.f32.xlu1 %v346_v56  ;;  %v171_v56 = vld [vmem:[#allocation2 + $0xf0] sm:$0xff] }
  0x59   :  { %v291_v61 = vmul.f32 %v1053_v5, %v246_v49  ;;  %v247_v2 = vmul.f32 %v209_v59, %v171_v56 }
  0x5a   :  { %344 = vadd.xlane.f32.xlu0 %v343_v60  ;;  %v382_v60 = vsel %vm300_vm0, %v289_v47, 0.0 }
  0x5b   :  { %v388_v3 = vsel %vm300_vm0, %v291_v61, 0.0  ;;  %v292_v8 = vmul.f32 %v1053_v5, %v247_v2 }
  0x5c   :  { %353 = vadd.xlane.f32.xlu1 %v352_v6  ;;  %v293_v6 = vmul.f32 %v1053_v5, %v248_v62  ;;  %v1149_v5 = vld [vmem:[#allocation8] ss:$0 sm:$0xff] }
  0x5d   :  { %v391_v10 = vsel %vm300_vm0, %v292_v8, 0.0 }
  0x5e   :  { %350 = vadd.xlane.f32.xlu0 %v349_v9  ;;  %v394_v9 = vsel %vm300_vm0, %v293_v6, 0.0 }
  0x60   :  { %359 = vadd.xlane.f32.xlu1 %v358_v16 }
  0x62   :  { %356 = vadd.xlane.f32.xlu0 %v355_v19 }
  0x64   :  { %365 = vadd.xlane.f32.xlu1 %v364_v26 }
  0x66   :  { %362 = vadd.xlane.f32.xlu0 %v361_v29 }
  0x68   :  { %371 = vadd.xlane.f32.xlu1 %v370_v36 }
  0x6a   :  { %368 = vadd.xlane.f32.xlu0 %v367_v39 }
  0x6c   :  { %377 = vadd.xlane.f32.xlu1 %v376_v46 }
  0x6e   :  { %374 = vadd.xlane.f32.xlu0 %v373_v50 }
  0x70   :  { %383 = vadd.xlane.f32.xlu1 %v382_v60 }
  0x72   :  { %380 = vadd.xlane.f32.xlu0 %v379_v63 }
  0x74   :  { %389 = vadd.xlane.f32.xlu1 %v388_v3 }
  0x76   :  { %386 = vadd.xlane.f32.xlu0 %v385_v7 }
  0x78   :  { %395 = vadd.xlane.f32.xlu1 %v394_v9 }
  0x7a   :  { %392 = vadd.xlane.f32.xlu0 %v391_v10 }
  0x7c   :  { %401 = vadd.xlane.f32.xlu1 %v1088_v48 }
  0x7e   :  { %398 = vadd.xlane.f32.xlu0 %v1094_v54 }
  0x80   :  { %407 = vadd.xlane.f32.xlu1 %v1099_v57 }
  0x82   :  { %404 = vadd.xlane.f32.xlu0 %v1102_v58 }
  0x84   :  { %413 = vadd.xlane.f32.xlu1 %v1108_v1 }
  0x86   :  { %410 = vadd.xlane.f32.xlu0 %v1111_v4 }
  0xc9   :  { %v309_v11 = vpop.xlane.xlu1 %308 }
  0xca   :  { %v424_v12 = vadd.f32 %v1149_v5, %v309_v11 }
  0xcb   :  { %v303_v13 = vpop.xlane.xlu0 %302 }
  0xcc   :  { %v422_v14 = vadd.f32 %v1149_v5, %v303_v13  ;;  %v462_v15 = vsub.f32 0.0, %v424_v12 }
  0xcd   :  { %v312_v16 = vpop.xlane.xlu1 %311 }
  0xce   :  { %v460_v48 = vsub.f32 0.0, %v422_v14  ;;  %v502_v54 = vmul.f32 1.442695, %v462_v15  ;;  %v425_v57 = vadd.f32 %v1149_v5, %v312_v16 }
  0xcf   :  { %v306_v17 = vpop.xlane.xlu0 %305 }
  0xd0   :  { %v498_v58 = vmul.f32 1.442695, %v460_v48  ;;  %v423_v1 = vadd.f32 %v1149_v5, %v306_v17  ;;  %800 = vpow2.f32 %v502_v54  ;;  %v463_v4 = vsub.f32 0.0, %v425_v57 }
  0xd1   :  { %v318_v19 = vpop.xlane.xlu1 %317 }
  0xd2   :  { %802 = vpow2.f32 %v498_v58  ;;  %v461_v18 = vsub.f32 0.0, %v423_v1  ;;  %v504_v20 = vmul.f32 1.442695, %v463_v4  ;;  %v427_v21 = vadd.f32 %v1149_v5, %v318_v19 }
  0xd3   :  { %v315_v22 = vpop.xlane.xlu0 %314 }
  0xd4   :  { %v500_v23 = vmul.f32 1.442695, %v461_v18  ;;  %v426_v24 = vadd.f32 %v1149_v5, %v315_v22  ;;  %804 = vpow2.f32 %v504_v20  ;;  %v465_v25 = vsub.f32 0.0, %v427_v21 }
  0xd5   :  { %v324_v27 = vpop.xlane.xlu1 %323 }
  0xd6   :  { %806 = vpow2.f32 %v500_v23  ;;  %v464_v26 = vsub.f32 0.0, %v426_v24  ;;  %v508_v28 = vmul.f32 1.442695, %v465_v25  ;;  %v429_v29 = vadd.f32 %v1149_v5, %v324_v27 }
  0xd7   :  { %v321_v30 = vpop.xlane.xlu0 %320 }
  0xd8   :  { %v506_v31 = vmul.f32 1.442695, %v464_v26  ;;  %v428_v32 = vadd.f32 %v1149_v5, %v321_v30  ;;  %808 = vpow2.f32 %v508_v28  ;;  %v467_v33 = vsub.f32 0.0, %v429_v29 }
  0xd9   :  { %v330_v35 = vpop.xlane.xlu1 %329 }
  0xda   :  { %810 = vpow2.f32 %v506_v31  ;;  %v466_v34 = vsub.f32 0.0, %v428_v32  ;;  %v801_v36 = vpop.eup %800  ;;  %v512_v37 = vmul.f32 1.442695, %v467_v33  ;;  %v431_v38 = vadd.f32 %v1149_v5, %v330_v35 }
  0xdb   :  { %v327_v39 = vpop.xlane.xlu0 %326  ;;  %v576_v41 = vadd.f32 1.0, %v801_v36 }
  0xdc   :  { %v803_v40 = vpop.eup %802  ;;  %v510_v42 = vmul.f32 1.442695, %v466_v34  ;;  %v430_v43 = vadd.f32 %v1149_v5, %v327_v39  ;;  %812 = vpow2.f32 %v512_v37  ;;  %v469_v45 = vsub.f32 0.0, %v431_v38 }
  0xdd   :  { %v574_v44 = vadd.f32 1.0, %v803_v40  ;;  %814 = vrcp.f32 %v576_v41  ;;  %v336_v47 = vpop.xlane.xlu1 %335 }
  0xde   :  { %v468_v46 = vsub.f32 0.0, %v430_v43  ;;  %v805_v49 = vpop.eup %804  ;;  %v516_v50 = vmul.f32 1.442695, %v469_v45  ;;  %v433_v51 = vadd.f32 %v1149_v5, %v336_v47 }
  0xdf   :  { %816 = vrcp.f32 %v574_v44  ;;  %v333_v52 = vpop.xlane.xlu0 %332  ;;  %v577_v55 = vadd.f32 1.0, %v805_v49 }
  0xe0   :  { %v807_v53 = vpop.eup %806  ;;  %818 = vpow2.f32 %v510_v42  ;;  %v514_v56 = vmul.f32 1.442695, %v468_v46  ;;  %v432_v59 = vadd.f32 %v1149_v5, %v333_v52  ;;  %v471_v61 = vsub.f32 0.0, %v433_v51 }
  0xe1   :  { %v575_v60 = vadd.f32 1.0, %v807_v53  ;;  %820 = vpow2.f32 %v516_v50  ;;  %v342_v63 = vpop.xlane.xlu1 %341 }
  0xe2   :  { %822 = vrcp.f32 %v577_v55  ;;  %v470_v62 = vsub.f32 0.0, %v432_v59  ;;  %v809_v0 = vpop.eup %808  ;;  %v520_v2 = vmul.f32 1.442695, %v471_v61  ;;  %v435_v3 = vadd.f32 %v1149_v5, %v342_v63 }
  0xe3   :  { %824 = vrcp.f32 %v575_v60  ;;  %v339_v6 = vpop.xlane.xlu0 %338  ;;  %v579_v8 = vadd.f32 1.0, %v809_v0 }
  0xe4   :  { %v811_v7 = vpop.eup %810  ;;  %826 = vpow2.f32 %v514_v56  ;;  %v518_v9 = vmul.f32 1.442695, %v470_v62  ;;  %v434_v10 = vadd.f32 %v1149_v5, %v339_v6  ;;  %v473_v12 = vsub.f32 0.0, %v435_v3 }
  0xe5   :  { %v578_v11 = vadd.f32 1.0, %v811_v7  ;;  %828 = vpow2.f32 %v520_v2  ;;  %v348_v14 = vpop.xlane.xlu1 %347 }
  0xe6   :  { %830 = vrcp.f32 %v579_v8  ;;  %v472_v13 = vsub.f32 0.0, %v434_v10  ;;  %v813_v15 = vpop.eup %812  ;;  %v524_v48 = vmul.f32 1.442695, %v473_v12  ;;  %v437_v16 = vadd.f32 %v1149_v5, %v348_v14 }
  0xe7   :  { %832 = vrcp.f32 %v578_v11  ;;  %v345_v54 = vpop.xlane.xlu0 %344  ;;  %v815_v57 = vpop.eup %814  ;;  %v581_v17 = vadd.f32 1.0, %v813_v15 }
  0xe8   :  { %834 = vpow2.f32 %v518_v9  ;;  %v522_v58 = vmul.f32 1.442695, %v472_v13  ;;  %v436_v1 = vadd.f32 %v1149_v5, %v345_v54  ;;  %691 = vst.msk [vmem:[%s1345_s6 + $0x10] sm:$0xff] %vm688_vm1, %v815_v57  ;;  %v475_v18 = vsub.f32 0.0, %v437_v16 }
  0xe9   :  { %v817_v4 = vpop.eup %816  ;;  %836 = vpow2.f32 %v524_v48  ;;  %v354_v21 = vpop.xlane.xlu1 %353 }
  0xea   :  { %v819_v19 = vpop.eup %818  ;;  %689 = vst.msk [vmem:[%s1345_s6] sm:$0xff] %vm688_vm1, %v817_v4  ;;  %838 = vrcp.f32 %v581_v17  ;;  %v474_v20 = vsub.f32 0.0, %v436_v1  ;;  %v528_v24 = vmul.f32 1.442695, %v475_v18  ;;  %v439_v25 = vadd.f32 %v1149_v5, %v354_v21 }
  0xeb   :  { %v821_v22 = vpop.eup %820  ;;  %v580_v23 = vadd.f32 1.0, %v819_v19  ;;  %840 = vpow2.f32 %v522_v58  ;;  %v351_v26 = vpop.xlane.xlu0 %350 }
  0xec   :  { %v823_v27 = vpop.eup %822  ;;  %v583_v28 = vadd.f32 1.0, %v821_v22  ;;  %v526_v29 = vmul.f32 1.442695, %v474_v20  ;;  %v438_v30 = vadd.f32 %v1149_v5, %v351_v26  ;;  %v477_v32 = vsub.f32 0.0, %v439_v25 }
  0xed   :  { %v825_v31 = vpop.eup %824  ;;  %692 = vst.msk [vmem:[%s1345_s6 + $0x18] sm:$0xff] %vm688_vm1, %v823_v27  ;;  %842 = vrcp.f32 %v580_v23  ;;  %v360_v35 = vpop.xlane.xlu1 %359 }
  0xee   :  { %v827_v33 = vpop.eup %826  ;;  %690 = vst.msk [vmem:[%s1345_s6 + $0x8] sm:$0xff] %vm688_vm1, %v825_v31  ;;  %844 = vrcp.f32 %v583_v28  ;;  %v476_v34 = vsub.f32 0.0, %v438_v30  ;;  %v532_v38 = vmul.f32 1.442695, %v477_v32  ;;  %v441_v39 = vadd.f32 %v1149_v5, %v360_v35 }
  0xef   :  { %v829_v36 = vpop.eup %828  ;;  %v582_v37 = vadd.f32 1.0, %v827_v33  ;;  %846 = vpow2.f32 %v528_v24  ;;  %v357_v40 = vpop.xlane.xlu0 %356 }
  0xf0   :  { %v831_v41 = vpop.eup %830  ;;  %v585_v42 = vadd.f32 1.0, %v829_v36  ;;  %848 = vpow2.f32 %v526_v29  ;;  %v530_v43 = vmul.f32 1.442695, %v476_v34  ;;  %v440_v44 = vadd.f32 %v1149_v5, %v357_v40 }
  0xf1   :  { %v833_v45 = vpop.eup %832  ;;  %694 = vst.msk [vmem:[%s1345_s6 + $0x28] sm:$0xff] %vm688_vm1, %v831_v41  ;;  %850 = vrcp.f32 %v582_v37  ;;  %v479_v46 = vsub.f32 0.0, %v441_v39  ;;  %v366_v50 = vpop.xlane.xlu1 %365 }
  0xf2   :  { %v835_v47 = vpop.eup %834  ;;  %693 = vst.msk [vmem:[%s1345_s6 + $0x20] sm:$0xff] %vm688_vm1, %v833_v45  ;;  %852 = vrcp.f32 %v585_v42  ;;  %v478_v49 = vsub.f32 0.0, %v440_v44  ;;  %v443_v55 = vadd.f32 %v1149_v5, %v366_v50 }
  0xf3   :  { %v837_v51 = vpop.eup %836  ;;  %v584_v52 = vadd.f32 1.0, %v835_v47  ;;  %854 = vpow2.f32 %v532_v38  ;;  %v536_v53 = vmul.f32 1.442695, %v479_v46  ;;  %v363_v56 = vpop.xlane.xlu0 %362 }
  0xf4   :  { %v839_v59 = vpop.eup %838  ;;  %v587_v60 = vadd.f32 1.0, %v837_v51  ;;  %856 = vpow2.f32 %v530_v43  ;;  %v442_v61 = vadd.f32 %v1149_v5, %v363_v56  ;;  %v534_v63 = vmul.f32 1.442695, %v478_v49 }
  0xf5   :  { %v841_v62 = vpop.eup %840  ;;  %696 = vst.msk [vmem:[%s1345_s6 + $0x38] sm:$0xff] %vm688_vm1, %v839_v59  ;;  %858 = vrcp.f32 %v584_v52  ;;  %v481_v0 = vsub.f32 0.0, %v443_v55  ;;  %v372_v6 = vpop.xlane.xlu1 %371 }
  0xf6   :  { %860 = vrcp.f32 %v587_v60  ;;  %v586_v2 = vadd.f32 1.0, %v841_v62  ;;  %v480_v3 = vsub.f32 0.0, %v442_v61  ;;  %v445_v9 = vadd.f32 %v1149_v5, %v372_v6 }
  0xf7   :  { %v843_v7 = vpop.eup %842  ;;  %862 = vpow2.f32 %v536_v53  ;;  %v540_v8 = vmul.f32 1.442695, %v481_v0  ;;  %v369_v10 = vpop.xlane.xlu0 %368 }
  0xf8   :  { %v845_v11 = vpop.eup %844  ;;  %695 = vst.msk [vmem:[%s1345_s6 + $0x30] sm:$0xff] %vm688_vm1, %v843_v7  ;;  %864 = vrcp.f32 %v586_v2  ;;  %v538_v12 = vmul.f32 1.442695, %v480_v3  ;;  %v444_v13 = vadd.f32 %v1149_v5, %v369_v10  ;;  %v483_v15 = vsub.f32 0.0, %v445_v9 }
  0xf9   :  { %v847_v14 = vpop.eup %846  ;;  %698 = vst.msk [vmem:[%s1345_s6 + $0x48] sm:$0xff] %vm688_vm1, %v845_v11  ;;  %866 = vpow2.f32 %v534_v63  ;;  %v378_v57 = vpop.xlane.xlu1 %377 }
  0xfa   :  { %v849_v48 = vpop.eup %848  ;;  %v589_v16 = vadd.f32 1.0, %v847_v14  ;;  %868 = vpow2.f32 %v540_v8  ;;  %v482_v54 = vsub.f32 0.0, %v444_v13  ;;  %v544_v1 = vmul.f32 1.442695, %v483_v15 }
  0xfb   :  { %v851_v17 = vpop.eup %850  ;;  %v588_v58 = vadd.f32 1.0, %v849_v48  ;;  %870 = vpow2.f32 %v538_v12  ;;  %v447_v4 = vadd.f32 %v1149_v5, %v378_v57  ;;  %v375_v18 = vpop.xlane.xlu0 %374 }
  0xfc   :  { %v853_v19 = vpop.eup %852  ;;  %697 = vst.msk [vmem:[%s1345_s6 + $0x40] sm:$0xff] %vm688_vm1, %v851_v17  ;;  %872 = vrcp.f32 %v589_v16  ;;  %v542_v20 = vmul.f32 1.442695, %v482_v54  ;;  %v446_v21 = vadd.f32 %v1149_v5, %v375_v18 }
  0xfd   :  { %v855_v22 = vpop.eup %854  ;;  %700 = vst.msk [vmem:[%s1345_s6 + $0x58] sm:$0xff] %vm688_vm1, %v853_v19  ;;  %874 = vrcp.f32 %v588_v58  ;;  %v485_v23 = vsub.f32 0.0, %v447_v4  ;;  %v384_v27 = vpop.xlane.xlu1 %383 }
  0xfe   :  { %v857_v24 = vpop.eup %856  ;;  %v591_v25 = vadd.f32 1.0, %v855_v22  ;;  %876 = vpow2.f32 %v544_v1  ;;  %v484_v26 = vsub.f32 0.0, %v446_v21  ;;  %v449_v31 = vadd.f32 %v1149_v5, %v384_v27 }
  0xff   :  { %v859_v28 = vpop.eup %858  ;;  %v590_v29 = vadd.f32 1.0, %v857_v24  ;;  %878 = vpow2.f32 %v542_v20  ;;  %v548_v30 = vmul.f32 1.442695, %v485_v23  ;;  %v381_v32 = vpop.xlane.xlu0 %380 }
 0x100   :  { %v861_v33 = vpop.eup %860  ;;  %699 = vst.msk [vmem:[%s1345_s6 + $0x50] sm:$0xff] %vm688_vm1, %v859_v28  ;;  %880 = vrcp.f32 %v591_v25  ;;  %v546_v34 = vmul.f32 1.442695, %v484_v26  ;;  %v448_v35 = vadd.f32 %v1149_v5, %v381_v32  ;;  %v487_v37 = vsub.f32 0.0, %v449_v31 }
 0x101   :  { %v863_v36 = vpop.eup %862  ;;  %702 = vst.msk [vmem:[%s1345_s6 + $0x68] sm:$0xff] %vm688_vm1, %v861_v33  ;;  %882 = vrcp.f32 %v590_v29  ;;  %v390_v41 = vpop.xlane.xlu1 %389 }
 0x102   :  { %v865_v38 = vpop.eup %864  ;;  %v593_v39 = vadd.f32 1.0, %v863_v36  ;;  %884 = vpow2.f32 %v548_v30  ;;  %v486_v40 = vsub.f32 0.0, %v448_v35  ;;  %v552_v43 = vmul.f32 1.442695, %v487_v37 }
 0x103   :  { %v867_v42 = vpop.eup %866  ;;  %701 = vst.msk [vmem:[%s1345_s6 + $0x60] sm:$0xff] %vm688_vm1, %v865_v38  ;;  %886 = vpow2.f32 %v546_v34  ;;  %v451_v44 = vadd.f32 %v1149_v5, %v390_v41  ;;  %v387_v45 = vpop.xlane.xlu0 %386 }
 0x104   :  { %v869_v46 = vpop.eup %868  ;;  %888 = vrcp.f32 %v593_v39  ;;  %v592_v47 = vadd.f32 1.0, %v867_v42  ;;  %v450_v49 = vadd.f32 %v1149_v5, %v387_v45  ;;  %v550_v52 = vmul.f32 1.442695, %v486_v40 }
 0x105   :  { %v871_v50 = vpop.eup %870  ;;  %v595_v51 = vadd.f32 1.0, %v869_v46  ;;  %890 = vpow2.f32 %v552_v43  ;;  %v489_v53 = vsub.f32 0.0, %v451_v44  ;;  %v396_v60 = vpop.xlane.xlu1 %395 }
 0x106   :  { %v873_v55 = vpop.eup %872  ;;  %892 = vrcp.f32 %v592_v47  ;;  %v594_v56 = vadd.f32 1.0, %v871_v50  ;;  %v488_v59 = vsub.f32 0.0, %v450_v49  ;;  %v453_v63 = vadd.f32 %v1149_v5, %v396_v60 }
 0x107   :  { %v875_v61 = vpop.eup %874  ;;  %704 = vst.msk [vmem:[%s1345_s6 + $0x78] sm:$0xff] %vm688_vm1, %v873_v55  ;;  %894 = vrcp.f32 %v595_v51  ;;  %v556_v62 = vmul.f32 1.442695, %v489_v53  ;;  %v393_v0 = vpop.xlane.xlu0 %392 }
 0x108   :  { %v877_v2 = vpop.eup %876  ;;  %703 = vst.msk [vmem:[%s1345_s6 + $0x70] sm:$0xff] %vm688_vm1, %v875_v61  ;;  %896 = vrcp.f32 %v594_v56  ;;  %v452_v3 = vadd.f32 %v1149_v5, %v393_v0  ;;  %v554_v8 = vmul.f32 1.442695, %v488_v59  ;;  %v491_v9 = vsub.f32 0.0, %v453_v63 }
 0x109   :  { %v879_v6 = vpop.eup %878  ;;  %v597_v7 = vadd.f32 1.0, %v877_v2  ;;  %898 = vpow2.f32 %v550_v52  ;;  %v402_v13 = vpop.xlane.xlu1 %401 }
 0x10a   :  { %v881_v10 = vpop.eup %880  ;;  %v596_v11 = vadd.f32 1.0, %v879_v6  ;;  %900 = vpow2.f32 %v556_v62  ;;  %v490_v12 = vsub.f32 0.0, %v452_v3  ;;  %v560_v15 = vmul.f32 1.442695, %v491_v9 }
 0x10b   :  { %v883_v14 = vpop.eup %882  ;;  %706 = vst.msk [vmem:[%s1345_s6 + $0x88] sm:$0xff] %vm688_vm1, %v881_v10  ;;  %902 = vrcp.f32 %v597_v7  ;;  %v455_v48 = vadd.f32 %v1149_v5, %v402_v13  ;;  %v399_v16 = vpop.xlane.xlu0 %398 }
 0x10c   :  { %v885_v54 = vpop.eup %884  ;;  %705 = vst.msk [vmem:[%s1345_s6 + $0x80] sm:$0xff] %vm688_vm1, %v883_v14  ;;  %904 = vrcp.f32 %v596_v11  ;;  %v454_v57 = vadd.f32 %v1149_v5, %v399_v16  ;;  %v558_v1 = vmul.f32 1.442695, %v490_v12 }
 0x10d   :  { %v887_v17 = vpop.eup %886  ;;  %v599_v58 = vadd.f32 1.0, %v885_v54  ;;  %906 = vpow2.f32 %v554_v8  ;;  %v493_v4 = vsub.f32 0.0, %v455_v48  ;;  %v408_v21 = vpop.xlane.xlu1 %407 }
 0x10e   :  { %v889_v18 = vpop.eup %888  ;;  %v598_v19 = vadd.f32 1.0, %v887_v17  ;;  %908 = vpow2.f32 %v560_v15  ;;  %v492_v20 = vsub.f32 0.0, %v454_v57  ;;  %v457_v24 = vadd.f32 %v1149_v5, %v408_v21 }
 0x10f   :  { %v891_v22 = vpop.eup %890  ;;  %708 = vst.msk [vmem:[%s1345_s6 + $0x98] sm:$0xff] %vm688_vm1, %v889_v18  ;;  %910 = vrcp.f32 %v599_v58  ;;  %v564_v23 = vmul.f32 1.442695, %v493_v4  ;;  %v405_v25 = vpop.xlane.xlu0 %404 }
 0x110   :  { %v893_v26 = vpop.eup %892  ;;  %912 = vrcp.f32 %v598_v19  ;;  %v601_v27 = vadd.f32 1.0, %v891_v22  ;;  %v562_v28 = vmul.f32 1.442695, %v492_v20  ;;  %v456_v29 = vadd.f32 %v1149_v5, %v405_v25 }
 0x111   :  { %v895_v30 = vpop.eup %894  ;;  %707 = vst.msk [vmem:[%s1345_s6 + $0x90] sm:$0xff] %vm688_vm1, %v893_v26  ;;  %914 = vpow2.f32 %v558_v1  ;;  %v495_v31 = vsub.f32 0.0, %v457_v24  ;;  %v414_v34 = vpop.xlane.xlu1 %413 }
 0x112   :  { %v897_v32 = vpop.eup %896  ;;  %710 = vst.msk [vmem:[%s1345_s6 + $0xa8] sm:$0xff] %vm688_vm1, %v895_v30  ;;  %916 = vrcp.f32 %v601_v27  ;;  %v494_v33 = vsub.f32 0.0, %v456_v29  ;;  %v459_v37 = vadd.f32 %v1149_v5, %v414_v34 }
 0x113   :  { %v899_v35 = vpop.eup %898  ;;  %709 = vst.msk [vmem:[%s1345_s6 + $0xa0] sm:$0xff] %vm688_vm1, %v897_v32  ;;  %918 = vpow2.f32 %v564_v23  ;;  %v568_v36 = vmul.f32 1.442695, %v495_v31  ;;  %v411_v38 = vpop.xlane.xlu0 %410 }
 0x114   :  { %v901_v39 = vpop.eup %900  ;;  %v600_v40 = vadd.f32 1.0, %v899_v35  ;;  %920 = vpow2.f32 %v562_v28  ;;  %v566_v41 = vmul.f32 1.442695, %v494_v33  ;;  %v458_v42 = vadd.f32 %v1149_v5, %v411_v38 }
 0x115   :  { %v903_v43 = vpop.eup %902  ;;  %v603_v44 = vadd.f32 1.0, %v901_v39  ;;  %922 = vpow2.f32 %v568_v36  ;;  %v497_v45 = vsub.f32 0.0, %v459_v37 }
 0x116   :  { %v905_v46 = vpop.eup %904  ;;  %712 = vst.msk [vmem:[%s1345_s6 + $0xb8] sm:$0xff] %vm688_vm1, %v903_v43  ;;  %924 = vrcp.f32 %v600_v40  ;;  %v496_v47 = vsub.f32 0.0, %v458_v42 }
 0x117   :  { %v907_v49 = vpop.eup %906  ;;  %711 = vst.msk [vmem:[%s1345_s6 + $0xb0] sm:$0xff] %vm688_vm1, %v905_v46  ;;  %926 = vrcp.f32 %v603_v44  ;;  %v572_v5 = vmul.f32 1.442695, %v497_v45 }
 0x118   :  { %v909_v50 = vpop.eup %908  ;;  %v602_v51 = vadd.f32 1.0, %v907_v49  ;;  %928 = vpow2.f32 %v566_v41  ;;  %v570_v52 = vmul.f32 1.442695, %v496_v47 }
 0x119   :  { %v911_v53 = vpop.eup %910  ;;  %v605_v55 = vadd.f32 1.0, %v909_v50  ;;  %930 = vpow2.f32 %v572_v5 }
 0x11a   :  { %v913_v56 = vpop.eup %912  ;;  %714 = vst.msk [vmem:[%s1345_s6 + $0xc8] sm:$0xff] %vm688_vm1, %v911_v53  ;;  %932 = vrcp.f32 %v602_v51 }
 0x11b   :  { %v915_v59 = vpop.eup %914  ;;  %713 = vst.msk [vmem:[%s1345_s6 + $0xc0] sm:$0xff] %vm688_vm1, %v913_v56  ;;  %934 = vrcp.f32 %v605_v55 }
 0x11c   :  { %v917_v60 = vpop.eup %916  ;;  %v604_v61 = vadd.f32 1.0, %v915_v59  ;;  %936 = vpow2.f32 %v570_v52 }
 0x11d   :  { %v919_v62 = vpop.eup %918  ;;  %716 = vst.msk [vmem:[%s1345_s6 + $0xd8] sm:$0xff] %vm688_vm1, %v917_v60 }
 0x11e   :  { %v921_v63 = vpop.eup %920  ;;  %938 = vrcp.f32 %v604_v61  ;;  %v607_v0 = vadd.f32 1.0, %v919_v62 }
 0x11f   :  { %v923_v2 = vpop.eup %922  ;;  %v606_v3 = vadd.f32 1.0, %v921_v63 }
 0x120   :  { %v925_v6 = vpop.eup %924  ;;  %940 = vrcp.f32 %v607_v0  ;;  %v609_v7 = vadd.f32 1.0, %v923_v2 }
 0x121   :  { %v927_v8 = vpop.eup %926  ;;  %715 = vst.msk [vmem:[%s1345_s6 + $0xd0] sm:$0xff] %vm688_vm1, %v925_v6  ;;  %942 = vrcp.f32 %v606_v3 }
 0x122   :  { %v929_v9 = vpop.eup %928  ;;  %718 = vst.msk [vmem:[%s1345_s6 + $0xe8] sm:$0xff] %vm688_vm1, %v927_v8  ;;  %944 = vrcp.f32 %v609_v7 }
 0x123   :  { %v931_v10 = vpop.eup %930  ;;  %v608_v11 = vadd.f32 1.0, %v929_v9 }
 0x124   :  { %v933_v12 = vpop.eup %932  ;;  %v611_v13 = vadd.f32 1.0, %v931_v10 }
 0x125   :  { %v935_v14 = vpop.eup %934  ;;  %717 = vst.msk [vmem:[%s1345_s6 + $0xe0] sm:$0xff] %vm688_vm1, %v933_v12  ;;  %946 = vrcp.f32 %v608_v11 }
 0x126   :  { %v937_v15 = vpop.eup %936  ;;  %720 = vst.msk [vmem:[%s1345_s6 + $0xf8] sm:$0xff] %vm688_vm1, %v935_v14  ;;  %948 = vrcp.f32 %v611_v13 }
 0x127   :  { %v610_v48 = vadd.f32 1.0, %v937_v15 }
 0x128   :  { %v939_v16 = vpop.eup %938 }
 0x129   :  { %719 = vst.msk [vmem:[%s1345_s6 + $0xf0] sm:$0xff] %vm688_vm1, %v939_v16  ;;  %950 = vrcp.f32 %v610_v48 }
 0x12a   :  { %v941_v54 = vpop.eup %940 }
 0x12b   :  { %v943_v57 = vpop.eup %942  ;;  %722 = vst.msk [vmem:[%s1345_s6 + $0x108] sm:$0xff] %vm688_vm1, %v941_v54 }
 0x12c   :  { %v945_v17 = vpop.eup %944  ;;  %721 = vst.msk [vmem:[%s1345_s6 + $0x100] sm:$0xff] %vm688_vm1, %v943_v57 }
 0x12d   :  { %724 = vst.msk [vmem:[%s1345_s6 + $0x118] sm:$0xff] %vm688_vm1, %v945_v17 }
 0x12f   :  { %v947_v58 = vpop.eup %946 }
 0x130   :  { %v949_v1 = vpop.eup %948  ;;  %723 = vst.msk [vmem:[%s1345_s6 + $0x110] sm:$0xff] %vm688_vm1, %v947_v58 }
 0x131   :  { %726 = vst.msk [vmem:[%s1345_s6 + $0x128] sm:$0xff] %vm688_vm1, %v949_v1 }
 0x133   :  { %v951_v4 = vpop.eup %950 }
 0x134   :  { %725 = vst.msk [vmem:[%s1345_s6 + $0x120] sm:$0xff] %vm688_vm1, %v951_v4 }
 0x135   :  { %731 = vsyncmov [#allocation4] }
 0x138   :  { %s732_s8 = vpop.sfrf %731 }
 0x139   :  { %p780_p12 = scmp.ne.s32.totalorder %s732_s8, 0 }
 0x13b   :  { %736 = shalt.err (%p780_p12)  }
 0x13c   :  { %738 = vsyncmov [#allocation4 + $0x1] }
 0x13f   :  { %s739_s9 = vpop.sfrf %738 }
 0x140   :  { %p781_p13 = scmp.ne.s32.totalorder %s739_s9, 0 }
 0x142   :  { %743 = shalt.err (%p781_p13)  }

</bundles_post_ra>
